<compile_context>
chip_gen: v6e
topology: v6e:2x2x1
jax: 0.10.0
libtpu: 0.0.40
codegen_flags: <defaults>
</compile_context>

<pallas_src>
import jax
import jax.numpy as jnp
from jax.experimental import pallas as pl
from jax.experimental.pallas import tpu as pltpu


def _round_up(x, m):
    return ((x + m - 1) // m) * m


# VMEM sizing: stay v7x-safe (64 MiB per TensorCore -> scope well under it).
_VMEM_LIMIT_BYTES = 48 * 1024 * 1024     # scoped VMEM we ask Mosaic for
_VMEM_BUDGET_BYTES = 40 * 1024 * 1024    # working-set budget used to pick TM
_RESIDENT_W_MAX_BYTES = 8 * 1024 * 1024  # keep weight resident if it fits this


def patch_embed_kernel(x_ref, w_ref, b_ref, o_ref):
    # x_ref: (TM, Kp) bf16 rows of flattened patches (streamed)
    # w_ref: (Kp, TE) bf16 projection weight (VMEM-resident when TE == Ep)
    # b_ref: (1, TE)  f32 bias
    # o_ref: (TM, TE) output tile
    y = jnp.dot(x_ref[...], w_ref[...], preferred_element_type=jnp.float32)
    o_ref[...] = (y + b_ref[...]).astype(o_ref.dtype)


def patch_embedding(x, weight, bias, patch_size, *,
                    compute_dtype=jnp.bfloat16, out_dtype=None):
    """NCHW ViT patch embedding: Conv2d(k=s=P) -> flatten(2) -> transpose(1,2).

    x: (B, C, H, W); weight: (E, C, P, P); bias: (E,)  ->  (B, N, E)
    """
    B, C, H, W = x.shape
    E = weight.shape[0]
    P = patch_size
    Hp, Wp = H // P, W // P
    N = Hp * Wp
    K = C * P * P
    M = B * N
    out_dtype = x.dtype if out_dtype is None else out_dtype

    in_bytes = jnp.dtype(compute_dtype).itemsize
    out_bytes = jnp.dtype(out_dtype).itemsize

    # Lane-dense padded lane sizes. K padding keeps LHS vregs / contraction
    # full (padded weight rows are zero -> exact); E padding keeps output
    # stores unmasked (sliced off afterwards, no-op for real ViT where E%128==0).
    Kp = _round_up(K, 128)
    Ep = _round_up(E, 128)

    # ---- tiling ----
    w_bytes = Kp * Ep * in_bytes
    weight_resident = w_bytes <= _RESIDENT_W_MAX_BYTES
    if weight_resident:
        TE = Ep
    else:
        TE = 512 if Ep % 512 == 0 else (256 if Ep % 256 == 0 else 128)

    # Largest row tile whose working set (resident/buffered weight + double-
    # buffered activations and outputs + bias) fits the VMEM budget.
    TM = 32
    for cand in (2048, 1024, 512, 256, 128, 64, 32):
        foot = (Kp * TE * in_bytes * (1 if weight_resident else 2)
                + 2 * cand * Kp * in_bytes       # double-buffered activations
                + 2 * cand * TE * out_bytes      # double-buffered output
                + 2 * TE * 4)                    # bias
        if foot <= _VMEM_BUDGET_BYTES:
            TM = cand
            break
    TM = min(TM, _round_up(M, 32))

    # --- glue: patchify NCHW -> (M, K) rows, K ordered (C, P, P) to match the
    # Conv2d weight flattening. One XLA transpose pass (see TODO above). ---
    xp = x.reshape(B, C, Hp, P, Wp, P)
    xp = jnp.transpose(xp, (0, 2, 4, 1, 3, 5)).reshape(M, K).astype(compute_dtype)
    if Kp != K:
        xp = jnp.pad(xp, ((0, 0), (0, Kp - K)))

    # Weight / bias prep: one-time pass over ~1-2 MiB. In a real model hoist
    # this out of the per-forward path (fold into the checkpoint).
    w2d = weight.reshape(E, K).T.astype(compute_dtype)        # (K, E)
    if (Kp, Ep) != (K, E):
        w2d = jnp.pad(w2d, ((0, Kp - K), (0, Ep - E)))
    b2d = bias.astype(jnp.float32).reshape(1, E)
    if Ep != E:
        b2d = jnp.pad(b2d, ((0, 0), (0, Ep - E)))

    grid_m = pl.cdiv(M, TM)   # no M padding: only the edge block's store is masked

    if weight_resident:
        # 1-D grid over row tiles; weight + bias DMA'd exactly once.
        grid = (grid_m,)
        in_specs = [
            pl.BlockSpec((TM, Kp), lambda i: (i, 0)),    # streamed activations
            pl.BlockSpec((Kp, Ep), lambda i: (0, 0)),    # resident weight
            pl.BlockSpec((1, Ep), lambda i: (0, 0)),     # resident bias
        ]
        out_specs = pl.BlockSpec((TM, Ep), lambda i: (i, 0))
        dim_sem = ("parallel",)          # v7x: both TCs split row tiles
    else:
        # Rare fallback (huge E*K): rows outer with a large TM so the small
        # weight is the revisited operand and its refetch count (Mp/TM) stays low.
        grid = (grid_m, Ep // TE)
        in_specs = [
            pl.BlockSpec((TM, Kp), lambda i, j: (i, 0)),
            pl.BlockSpec((Kp, TE), lambda i, j: (0, j)),
            pl.BlockSpec((1, TE), lambda i, j: (0, j)),
        ]
        out_specs = pl.BlockSpec((TM, TE), lambda i, j: (i, j))
        dim_sem = ("parallel", "parallel")

    out = pl.pallas_call(
        patch_embed_kernel,
        out_shape=jax.ShapeDtypeStruct((M, Ep), out_dtype),
        grid_spec=pltpu.PrefetchScalarGridSpec(
            num_scalar_prefetch=0,
            grid=grid,
            in_specs=in_specs,
            out_specs=out_specs,
        ),
        compiler_params=pltpu.CompilerParams(
            dimension_semantics=dim_sem,
            vmem_limit_bytes=_VMEM_LIMIT_BYTES,
        ),
    )(xp, w2d, b2d)

    if Ep != E:
        out = out[:, :E]
    # (B, N, E) == proj(x).flatten(2).transpose(1, 2)
    return out.reshape(B, N, E)


if __name__ == "__main__":
    # Small shapes consistent with the module: img=16, patch=4 -> 16 patches.
    B, C, IMG, P, E = 2, 4, 16, 4, 32

    key = jax.random.PRNGKey(0)
    kx, kw, kb = jax.random.split(key, 3)

    x = jax.random.normal(kx, (B, C, IMG, IMG), dtype=jnp.float32)
    # Deterministic parameter init (synthetic; shapes from nn.Conv2d(C, E, P, P))
    fan_in = C * P * P
    bound = 1.0 / (fan_in ** 0.5)
    weight = jax.random.uniform(kw, (E, C, P, P), minval=-bound, maxval=bound,
                                dtype=jnp.float32)
    bias = jax.random.uniform(kb, (E,), minval=-bound, maxval=bound,
                              dtype=jnp.float32)

    out = patch_embedding(x, weight, bias, patch_size=P)
    out = jax.block_until_ready(out)

    # Reference: same Conv2d semantics, with inputs rounded to bf16 to match
    # the kernel's bf16-operand / f32-accumulate matmul.
    xr = x.astype(jnp.bfloat16).astype(jnp.float32)
    wr = weight.astype(jnp.bfloat16).astype(jnp.float32)
    ref = jax.lax.conv_general_dilated(
        xr, wr, window_strides=(P, P), padding="VALID",
        dimension_numbers=("NCHW", "OIHW", "NCHW"))
    ref = ref + bias[None, :, None, None]
    ref = ref.reshape(B, E, -1).transpose(0, 2, 1)  # flatten(2).transpose(1,2)

    assert out.shape == (B, (IMG // P) ** 2, E), out.shape
    assert jnp.allclose(out, ref, atol=2e-3, rtol=2e-3), \
        float(jnp.max(jnp.abs(out - ref)))
    print("KERNEL_OK")
</pallas_src>

<mosaic_0001>
module attributes {stable_mosaic.version = 11 : i64} {
  func.func @patch_embed_kernel(%arg0: i32, %arg1: memref<32x128xbf16, #tpu.memory_space<vmem>>, %arg2: memref<128x128xbf16, #tpu.memory_space<vmem>>, %arg3: memref<1x128xf32, #tpu.memory_space<vmem>>, %arg4: memref<32x128xf32, #tpu.memory_space<vmem>>) attributes {dimension_semantics = [#tpu.dimension_semantics<parallel>], iteration_bounds = array<i64: 1>, scalar_prefetch = 0 : i64, scratch_operands = 0 : i64, tpu.core_type = #tpu.core_type<tc>, window_params = [{transform_indices = @transform_0, window_bounds = array<i64: 32, 128>}, {pipeline_mode = #tpu.pipeline_mode<synchronous>, transform_indices = @transform_1, window_bounds = array<i64: 128, 128>}, {pipeline_mode = #tpu.pipeline_mode<synchronous>, transform_indices = @transform_2, window_bounds = array<i64: 1, 128>}, {transform_indices = @transform_3, window_bounds = array<i64: 32, 128>}]} {
    %c0 = arith.constant 0 : index
    %c0_0 = arith.constant 0 : index
    %0 = vector.load %arg1[%c0, %c0_0] : memref<32x128xbf16, #tpu.memory_space<vmem>>, vector<32x128xbf16>
    %c0_1 = arith.constant 0 : index
    %c0_2 = arith.constant 0 : index
    %1 = vector.load %arg2[%c0_1, %c0_2] : memref<128x128xbf16, #tpu.memory_space<vmem>>, vector<128x128xbf16>
    %cst = arith.constant dense<0.000000e+00> : vector<32x128xf32>
    %2 = tpu.matmul %0, %1, %cst {dimension_numbers = #tpu.dot_dimension_numbers<[1], [0], [0], [1], [0, 0, 1, 1], [], []>} : vector<32x128xbf16>, vector<128x128xbf16>, vector<32x128xf32> -> vector<32x128xf32>
    %c0_3 = arith.constant 0 : index
    %c0_4 = arith.constant 0 : index
    %3 = vector.load %arg3[%c0_3, %c0_4] : memref<1x128xf32, #tpu.memory_space<vmem>>, vector<1x128xf32>
    %4 = vector.broadcast %3 : vector<1x128xf32> to vector<32x128xf32>
    %5 = arith.addf %2, %4 : vector<32x128xf32>
    %c0_5 = arith.constant 0 : index
    %c0_6 = arith.constant 0 : index
    %6 = vector.load %arg4[%c0_5, %c0_6] : memref<32x128xf32, #tpu.memory_space<vmem>>, vector<32x128xf32>
    tpu.vector_store %arg4[%c0_5, %c0_6], %5 {strides = array<i32>} : memref<32x128xf32, #tpu.memory_space<vmem>>, vector<32x128xf32>,
    return
  }
  func.func @transform_0(%arg0: i32) -> (i32, i32) {
    %c0_i32 = arith.constant 0 : i32
    %c0_i32_0 = arith.constant 0 : i32
    return %arg0, %c0_i32 : i32, i32
  }
  func.func @transform_1(%arg0: i32) -> (i32, i32) {
    %c0_i32 = arith.constant 0 : i32
    %c0_i32_0 = arith.constant 0 : i32
    %c0_i32_1 = arith.constant 0 : i32
    return %c0_i32, %c0_i32_0 : i32, i32
  }
  func.func @transform_2(%arg0: i32) -> (i32, i32) {
    %c0_i32 = arith.constant 0 : i32
    %c0_i32_0 = arith.constant 0 : i32
    %c0_i32_1 = arith.constant 0 : i32
    return %c0_i32, %c0_i32_0 : i32, i32
  }
  func.func @transform_3(%arg0: i32) -> (i32, i32) {
    %c0_i32 = arith.constant 0 : i32
    %c0_i32_0 = arith.constant 0 : i32
    return %arg0, %c0_i32 : i32, i32
  }
}

</mosaic_0001>

<bundles_post_ra>
// kernel: tpu_custom_call.1
= control target key start
LH: loop header
LB: loop body
LE: loop exit
PB: predicated region body
PF: predicated region fallthrough
CT: control target
= control target key end

     0   :  { %8 = vsyncpa [#allocation3], 0  ;;  %s365_s0 = inlined_call_operand.hbm [shape: bf16[32,128], index: 0, kind: input, shape index: {}]   ;;  %s366_s1 = inlined_call_operand.hbm [shape: bf16[128,128], index: 1, kind: input, shape index: {}]   ;;  %s367_s2 = inlined_call_operand.vmem [shape: f32[1,128], index: 2, kind: input, shape index: {}]   ;;  %s368_s3 = inlined_call_operand.hbm [shape: f32[32,128], index: 3, kind: output, shape index: {}]  }
   0x1   :  { %9 = vsyncpa [#allocation6], 0 }
   0x2   :  { %10 = vsyncpa [#allocation4], 0  ;;  %s326_s12 = smov [#allocation2]  }
   0x3   :  { %s16_s13 = sshll.u32 %s326_s12, 4  ;;  %s17_s13 = int_to_ptr.vmem [resolvable:$true] %s16_s13 }
   0x4   :  { %s268_s14 = scalar_lea.vmem %s17_s13, 256  ;;  %p273_p1 = scmp.lt.s32.totalorder %s17_s13, %s17_s13 }
   0x5   :  { %p269_p0 = scmp.ne.s32.totalorder %s17_s13, %s268_s14  ;;  %p274_p2 = scmp.lt.s32.totalorder %s268_s14, %s268_s14 }
   0x7   :  { %p275_p3 = por %p274_p2, %p273_p1 }
   0x9   :  { %p276_p4 = pnand %p275_p3, %p269_p0 }
   0xb   :  { %279 = shalt.err (!%p276_p4)
}
   0xc   :  { %s327_s15 = smov 64   ;;  %s328_s16 = smov 4  }
   0xd   :  { %22 = dma.hbm_to_vmem [thread:$0]  %s365_s0, 256, %s17_s13, [#allocation3], %s327_s15, %s327_s15, %s328_s16  }
   0xe   :  { %s329_s19 = smov [#allocation5]  }
   0xf   :  { %s28_s20 = sshll.u32 %s329_s19, 4  ;;  %s29_s20 = int_to_ptr.vmem [resolvable:$true] %s28_s20 }
  0x10   :  { %s288_s21 = scalar_lea.vmem %s29_s20, 1024  ;;  %p293_p6 = scmp.lt.s32.totalorder %s29_s20, %s29_s20 }
  0x11   :  { %p289_p5 = scmp.ne.s32.totalorder %s29_s20, %s288_s21  ;;  %p294_p7 = scmp.lt.s32.totalorder %s288_s21, %s288_s21 }
  0x13   :  { %p295_p8 = por %p294_p7, %p293_p6 }
  0x15   :  { %p296_p9 = pnand %p295_p8, %p289_p5 }
  0x17   :  { %299 = shalt.err (!%p296_p9)
}
  0x18   :  { %34 = dma.hbm_to_vmem [thread:$0]  %s366_s1, 1024, %s29_s20, [#allocation6], %s327_s15, %s327_s15, %s328_s16  }
  0x19   :  { %320 = dma.done.wait [#allocation3], 256  }
  0x1a   :  { %321 = vsyncadd [#allocation3], 4294967040 }
  0x1b   :  { %322 = dma.done.wait [#allocation6], 1024  }
  0x1c   :  { %323 = vsyncadd [#allocation6], 4294966272  ;;  %v250_v0 = vld [vmem:[#allocation5 + $0x38] sm:$0xff]   ;;  %v251_v1 = vld [vmem:[#allocation5 + $0x30] sm:$0xff]   ;;  %s330_s24 = smov [#allocation7]  }
  0x1d   :  { %223 = vmatprep.subr.bf16.mxu0 %v250_v0  ;;  %v252_v2 = vld [vmem:[#allocation5 + $0x28] sm:$0xff]   ;;  %v253_v3 = vld [vmem:[#allocation5 + $0x20] sm:$0xff]   ;;  %v258_v4 = vld [vmem:[#allocation2] sm:$0xff]   ;;  %s189_s25 = sshll.u32 %s330_s24, 4  ;;  %s190_s25 = int_to_ptr.vmem [resolvable:$true] %s189_s25 }
  0x1e   :  { %224 = vmatpush3.bf16.msra.mxu0 %v250_v0  ;;  %239 = vmatprep.mubr.bf16.mxu0 %v258_v4  ;;  %v254_v5 = vld [vmem:[#allocation5 + $0x18] sm:$0xff]   ;;  %v255_v6 = vld [vmem:[#allocation5 + $0x10] sm:$0xff]   ;;  %v256_v7 = vld [vmem:[#allocation5 + $0x8] sm:$0xff]   ;;  %s300_s26 = scalar_lea.vmem %s190_s25, 512  ;;  %p305_p11 = scmp.lt.s32.totalorder %s190_s25, %s190_s25 }
  0x1f   :  { %225 = vmatprep.subr.bf16.mxu0 %v251_v1  ;;  %v257_v8 = vld [vmem:[#allocation5] sm:$0xff]   ;;  %v259_v9 = vld [vmem:[#allocation2 + $0x8] sm:$0xff]   ;;  %v202_v10 = vld [vmem:[%s367_s2] ss:$0 sm:$0xff]  ;;  %p301_p10 = scmp.ne.s32.totalorder %s190_s25, %s300_s26  ;;  %p306_p12 = scmp.lt.s32.totalorder %s300_s26, %s300_s26 }
  0x21   :  { %p307_p13 = por %p306_p12, %p305_p11 }
  0x22   :  { %226 = vmatpush3.bf16.msra.mxu0 %v251_v1 }
  0x23   :  { %227 = vmatprep.subr.bf16.mxu0 %v252_v2  ;;  %p308_p0 = pnand %p307_p13, %p301_p10 }
  0x26   :  { %228 = vmatpush3.bf16.msra.mxu0 %v252_v2 }
  0x27   :  { %229 = vmatprep.subr.bf16.mxu0 %v253_v3 }
  0x2a   :  { %230 = vmatpush3.bf16.msra.mxu0 %v253_v3 }
  0x2b   :  { %231 = vmatprep.subr.bf16.mxu0 %v254_v5 }
  0x2e   :  { %232 = vmatpush3.bf16.msra.mxu0 %v254_v5 }
  0x2f   :  { %233 = vmatprep.subr.bf16.mxu0 %v255_v6 }
  0x32   :  { %234 = vmatpush3.bf16.msra.mxu0 %v255_v6 }
  0x33   :  { %235 = vmatprep.subr.bf16.mxu0 %v256_v7 }
  0x36   :  { %236 = vmatpush3.bf16.msra.mxu0 %v256_v7 }
  0x37   :  { %237 = vmatprep.subr.bf16.mxu0 %v257_v8 }
  0x3a   :  { %238 = vmatpush3.bf16.msra.mxu0 %v257_v8 }
  0x3d   :  { %240 = vmatmul.mubr.bf16.vlgmr.msra.gmra.mxu0 %v259_v9 }
  0xfd   :  { %v241_v11 = vpop.f32.mrf.mxu0 }
  0xfe   :  { %v174_v12 = vadd.f32 %v241_v11, %v202_v10 }
  0xff   :  { %v165_v13 = vpop.f32.mrf.mxu0 }
 0x100   :  { %182 = vst [vmem:[#allocation7 + $0x10] sm:$0xff] %v174_v12  ;;  %v166_v14 = vadd.f32 %v202_v10, %v165_v13 }
 0x101   :  { %v242_v15 = vpop.f32.mrf.mxu0 }
 0x102   :  { %180 = vst [vmem:[#allocation7] sm:$0xff] %v166_v14  ;;  %v177_v16 = vadd.f32 %v242_v15, %v202_v10 }
 0x103   :  { %v168_v17 = vpop.f32.mrf.mxu0 }
 0x104   :  { %183 = vst [vmem:[#allocation7 + $0x18] sm:$0xff] %v177_v16  ;;  %v169_v18 = vadd.f32 %v202_v10, %v168_v17 }
 0x106   :  { %181 = vst [vmem:[#allocation7 + $0x8] sm:$0xff] %v169_v18 }
 0x107   :  { %311 = shalt.err (!%p308_p0)
}
 0x108   :  { %s331_s2 = smov 128   ;;  %s332_s27 = smov 8  }
 0x109   :  { %195 = dma.vmem_to_hbm [thread:$0]  %s190_s25, 512, %s368_s3, [#allocation4], %s331_s2, %s331_s2, %s332_s27  }
 0x10a   :  { %324 = dma.done.wait [#allocation4], 512  }
 0x10b   :  { %325 = vsyncadd [#allocation4], 4294966784 }
 0x10c   :  { %199 = vsyncpa [#allocation3], 1 }
 0x10d   :  { %200 = vsyncpa [#allocation6], 1 }
 0x10e   :  { %201 = vsyncpa [#allocation4], 1 }

</bundles_post_ra>
